<compile_context>
chip_gen: v5e
topology: v5e:2x2
jax: 0.10.0
libtpu: 0.0.40
codegen_flags: <defaults>
</compile_context>

<pallas_src>
import jax
import jax.numpy as jnp
from jax.experimental import pallas as pl
from jax.experimental.pallas import tpu as pltpu


_LANES = 128
_SUBLANES = 8
_NUM_SPLITS = 2            # leading 'parallel' grid axis (both TCs on megacore chips)
_MAX_BLOCK_ROWS = 4096     # 4096 x 128 x 4B = 2 MiB per input per pipeline buffer


def _round_up(x, m):
    return ((x + m - 1) // m) * m


def _cdiv(a, b):
    return -(-a // b)


def _pad_to_slab(x, padded_rows, pad_value):
    """Flatten x and pad (with pad_value) into a lane/sublane-dense (rows, 128) slab."""
    flat = x.reshape(-1)
    pad = padded_rows * _LANES - flat.shape[0]
    if pad:
        flat = jnp.pad(flat, (0, pad), constant_values=pad_value)
    return flat.reshape(padded_rows, _LANES)


def _make_kernel(n_img, n_labels, block_rows, lab_rows):
    inv_img = 1.0 / float(n_img)           # true (unpadded) element count
    adv_scale = 0.1 * 0.5 / float(n_labels)

    def kernel(labels_ref, out_img_ref, tgt_img_ref, part_ref, acc_ref):
        c = pl.program_id(0)   # parallel split (TensorCore on megacore chips)
        i = pl.program_id(1)   # streaming reduction step within the split

        @pl.when(i == 0)
        def _init():
            acc_ref[...] = jnp.zeros_like(acc_ref)

        # Streaming L1 partial: pure VPU sub/abs/add; reduce only to a
        # vreg-shaped (8, 128) tile, cross-lane reduce deferred to finalize.
        diff = out_img_ref[...].astype(jnp.float32) - tgt_img_ref[...].astype(jnp.float32)
        absd = jnp.abs(diff)
        acc_ref[...] += absd.reshape(block_rows // _SUBLANES, _SUBLANES, _LANES).sum(axis=0)

        @pl.when(i == pl.num_programs(1) - 1)
        def _finalize():
            # L1 contribution, already scaled by 1/N_img.
            part = acc_ref[...] * inv_img
            # Adversarial contribution: labels are tiny and resident; padding
            # value is 1.0 so (1 - pad)^2 == 0. Only split 0 contributes.
            lab = labels_ref[...].astype(jnp.float32)
            adv_map = ((1.0 - lab) ** 2).reshape(
                lab_rows // _SUBLANES, _SUBLANES, _LANES).sum(axis=0)
            scale = jnp.where(c == 0, adv_scale, 0.0)
            part_ref[...] = part + scale * adv_map

    return kernel


def generator_loss(out_labels, out_images, target_images):
    n_img = int(out_images.size)
    n_lab = int(out_labels.size)

    # ---- labels: (lab_rows, 128) slab padded with 1.0 ((1 - 1)^2 == 0) ----
    lab_rows = _round_up(max(1, _cdiv(n_lab, _LANES)), _SUBLANES)
    labels2d = _pad_to_slab(out_labels, lab_rows, 1.0)

    # ---- images: (padded_rows, 128) slabs padded with 0.0 (diff == 0) ----
    rows = _cdiv(n_img, _LANES)
    rows_per_split = _cdiv(rows, _NUM_SPLITS)
    block_rows = min(_MAX_BLOCK_ROWS, _round_up(rows_per_split, _SUBLANES))
    blocks_per_split = _cdiv(rows_per_split, block_rows)
    padded_rows = _NUM_SPLITS * blocks_per_split * block_rows

    o2d = _pad_to_slab(out_images, padded_rows, 0.0)
    t2d = _pad_to_slab(target_images, padded_rows, 0.0)

    kernel = _make_kernel(n_img, n_lab, block_rows, lab_rows)

    img_spec = pl.BlockSpec(
        (block_rows, _LANES),
        lambda c, i, nb=blocks_per_split: (c * nb + i, 0),
    )

    grid_spec = pltpu.PrefetchScalarGridSpec(
        num_scalar_prefetch=0,
        grid=(_NUM_SPLITS, blocks_per_split),
        in_specs=[
            pl.BlockSpec((lab_rows, _LANES), lambda c, i: (0, 0)),  # resident, tiny
            img_spec,
            img_spec,
        ],
        out_specs=pl.BlockSpec((_SUBLANES, _LANES), lambda c, i: (c, 0)),
        scratch_shapes=[pltpu.VMEM((_SUBLANES, _LANES), jnp.float32)],
    )

    bytes_accessed = int(o2d.nbytes) + int(t2d.nbytes) + int(labels2d.nbytes) \
        + _NUM_SPLITS * _SUBLANES * _LANES * 4

    partials = pl.pallas_call(
        kernel,
        out_shape=jax.ShapeDtypeStruct((_NUM_SPLITS * _SUBLANES, _LANES), jnp.float32),
        grid_spec=grid_spec,
        compiler_params=pltpu.CompilerParams(
            dimension_semantics=("parallel", "arbitrary")),
        cost_estimate=pl.CostEstimate(
            flops=3 * n_img, transcendentals=0, bytes_accessed=bytes_accessed),
    )(labels2d, o2d, t2d)

    # Partial tiles already carry the 1/N scaling and the 0.1 * adversarial
    # term; only the tiny cross-lane/sublane tree-sum remains.
    return jnp.sum(partials)


def generator_loss_ref(out_labels, out_images, target_images):
    adv = 0.5 * jnp.mean((1.0 - out_labels) ** 2)
    l1 = jnp.mean(jnp.abs(out_images - target_images))
    return l1 + 0.1 * adv


if __name__ == "__main__":
    key = jax.random.PRNGKey(0)
    k1, k2, k3 = jax.random.split(key, 3)

    B, C, H, W = 2, 4, 16, 16
    out_labels = jax.random.uniform(k1, (B, 1), dtype=jnp.float32)       # discriminator outputs
    out_images = jax.random.normal(k2, (B, C, H, W), dtype=jnp.float32)  # generated images (NCHW)
    target_images = jax.random.normal(k3, (B, C, H, W), dtype=jnp.float32)

    loss = jax.block_until_ready(generator_loss(out_labels, out_images, target_images))
    ref = jax.block_until_ready(generator_loss_ref(out_labels, out_images, target_images))

    assert jnp.allclose(loss, ref, rtol=1e-5, atol=1e-6), (loss, ref)
    print("KERNEL_OK")
</pallas_src>

<mosaic_0001>
module attributes {stable_mosaic.version = 11 : i64} {
  func.func @kernel(%arg0: i32, %arg1: i32, %arg2: memref<8x128xf32, #tpu.memory_space<vmem>>, %arg3: memref<8x128xf32, #tpu.memory_space<vmem>>, %arg4: memref<8x128xf32, #tpu.memory_space<vmem>>, %arg5: memref<8x128xf32, #tpu.memory_space<vmem>>, %arg6: memref<8x128xf32, #tpu.memory_space<vmem>>) attributes {dimension_semantics = [#tpu.dimension_semantics<parallel>, #tpu.dimension_semantics<arbitrary>], iteration_bounds = array<i64: 2, 1>, scalar_prefetch = 0 : i64, scratch_operands = 1 : i64, tpu.core_type = #tpu.core_type<tc>, window_params = [{pipeline_mode = #tpu.pipeline_mode<synchronous>, transform_indices = @transform_0, window_bounds = array<i64: 8, 128>}, {transform_indices = @transform_1, window_bounds = array<i64: 8, 128>}, {transform_indices = @transform_2, window_bounds = array<i64: 8, 128>}, {transform_indices = @transform_3, window_bounds = array<i64: 8, 128>}]} {
    %c0_i32 = arith.constant 0 : i32
    %0 = arith.cmpi eq, %arg1, %c0_i32 : i32
    %1 = arith.extui %0 : i1 to i32
    %c0_i32_0 = arith.constant 0 : i32
    %2 = arith.cmpi ne, %1, %c0_i32_0 : i32
    scf.if %2 {
      %cst_10 = arith.constant 0.000000e+00 : f32
      %15 = vector.broadcast %cst_10 : f32 to vector<8x128xf32>
      %c0_11 = arith.constant 0 : index
      %c0_12 = arith.constant 0 : index
      %16 = vector.load %arg6[%c0_11, %c0_12] : memref<8x128xf32, #tpu.memory_space<vmem>>, vector<8x128xf32>
      tpu.vector_store %arg6[%c0_11, %c0_12], %15 {strides = array<i32>} : memref<8x128xf32, #tpu.memory_space<vmem>>, vector<8x128xf32>,
    } else {
    }
    %c0 = arith.constant 0 : index
    %c0_1 = arith.constant 0 : index
    %3 = vector.load %arg3[%c0, %c0_1] : memref<8x128xf32, #tpu.memory_space<vmem>>, vector<8x128xf32>
    %c0_2 = arith.constant 0 : index
    %c0_3 = arith.constant 0 : index
    %4 = vector.load %arg4[%c0_2, %c0_3] : memref<8x128xf32, #tpu.memory_space<vmem>>, vector<8x128xf32>
    %5 = arith.subf %3, %4 : vector<8x128xf32>
    %6 = math.absf %5 : vector<8x128xf32>
    %c0_4 = arith.constant 0 : index
    %c0_5 = arith.constant 0 : index
    %7 = vector.load %arg6[%c0_4, %c0_5] : memref<8x128xf32, #tpu.memory_space<vmem>>, vector<8x128xf32>
    %8 = vector.shape_cast %6 : vector<8x128xf32> to vector<1x8x128xf32>
    %cst = arith.constant dense<0.000000e+00> : vector<8x128xf32>
    %9 = vector.multi_reduction <add>, %8, %cst [0] : vector<1x8x128xf32> to vector<8x128xf32>
    %10 = arith.addf %7, %9 : vector<8x128xf32>
    %c0_6 = arith.constant 0 : index
    %c0_7 = arith.constant 0 : index
    %11 = vector.load %arg6[%c0_6, %c0_7] : memref<8x128xf32, #tpu.memory_space<vmem>>, vector<8x128xf32>
    tpu.vector_store %arg6[%c0_6, %c0_7], %10 {strides = array<i32>} : memref<8x128xf32, #tpu.memory_space<vmem>>, vector<8x128xf32>,
    %c0_i32_8 = arith.constant 0 : i32
    %12 = arith.cmpi eq, %arg1, %c0_i32_8 : i32
    %13 = arith.extui %12 : i1 to i32
    %c0_i32_9 = arith.constant 0 : i32
    %14 = arith.cmpi ne, %13, %c0_i32_9 : i32
    scf.if %14 {
      %c0_10 = arith.constant 0 : index
      %c0_11 = arith.constant 0 : index
      %15 = vector.load %arg6[%c0_10, %c0_11] : memref<8x128xf32, #tpu.memory_space<vmem>>, vector<8x128xf32>
      %cst_12 = arith.constant 4.8828125E-4 : f32
      %16 = vector.broadcast %cst_12 : f32 to vector<8x128xf32>
      %17 = arith.mulf %15, %16 : vector<8x128xf32>
      %c0_13 = arith.constant 0 : index
      %c0_14 = arith.constant 0 : index
      %18 = vector.load %arg2[%c0_13, %c0_14] : memref<8x128xf32, #tpu.memory_space<vmem>>, vector<8x128xf32>
      %cst_15 = arith.constant 1.000000e+00 : f32
      %19 = vector.broadcast %cst_15 : f32 to vector<8x128xf32>
      %20 = arith.subf %19, %18 : vector<8x128xf32>
      %21 = arith.mulf %20, %20 : vector<8x128xf32>
      %22 = vector.shape_cast %21 : vector<8x128xf32> to vector<1x8x128xf32>
      %cst_16 = arith.constant dense<0.000000e+00> : vector<8x128xf32>
      %23 = vector.multi_reduction <add>, %22, %cst_16 [0] : vector<1x8x128xf32> to vector<8x128xf32>
      %c0_i32_17 = arith.constant 0 : i32
      %24 = arith.cmpi eq, %arg0, %c0_i32_17 : i32
      %cst_18 = arith.constant 2.500000e-02 : f32
      %cst_19 = arith.constant 0.000000e+00 : f32
      %25 = arith.select %24, %cst_18, %cst_19 : f32
      %26 = vector.broadcast %25 : f32 to vector<8x128xf32>
      %27 = arith.mulf %26, %23 : vector<8x128xf32>
      %28 = arith.addf %17, %27 : vector<8x128xf32>
      %c0_20 = arith.constant 0 : index
      %c0_21 = arith.constant 0 : index
      %29 = vector.load %arg5[%c0_20, %c0_21] : memref<8x128xf32, #tpu.memory_space<vmem>>, vector<8x128xf32>
      tpu.vector_store %arg5[%c0_20, %c0_21], %28 {strides = array<i32>} : memref<8x128xf32, #tpu.memory_space<vmem>>, vector<8x128xf32>,
    } else {
    }
    return
  }
  func.func @transform_0(%arg0: i32, %arg1: i32) -> (i32, i32) {
    %c0_i32 = arith.constant 0 : i32
    %c0_i32_0 = arith.constant 0 : i32
    %c0_i32_1 = arith.constant 0 : i32
    return %c0_i32, %c0_i32_0 : i32, i32
  }
  func.func @transform_1(%arg0: i32, %arg1: i32) -> (i32, i32) {
    %c1_i32 = arith.constant 1 : i32
    %0 = arith.muli %arg0, %c1_i32 : i32
    %1 = arith.addi %0, %arg1 : i32
    %c0_i32 = arith.constant 0 : i32
    %c0_i32_0 = arith.constant 0 : i32
    return %1, %c0_i32 : i32, i32
  }
  func.func @transform_2(%arg0: i32, %arg1: i32) -> (i32, i32) {
    %c1_i32 = arith.constant 1 : i32
    %0 = arith.muli %arg0, %c1_i32 : i32
    %1 = arith.addi %0, %arg1 : i32
    %c0_i32 = arith.constant 0 : i32
    %c0_i32_0 = arith.constant 0 : i32
    return %1, %c0_i32 : i32, i32
  }
  func.func @transform_3(%arg0: i32, %arg1: i32) -> (i32, i32) {
    %c0_i32 = arith.constant 0 : i32
    %c0_i32_0 = arith.constant 0 : i32
    return %arg0, %c0_i32 : i32, i32
  }
}

</mosaic_0001>

<bundles_post_ra>
// kernel: tpu_custom_call.1
= control target key start
LH: loop header
LB: loop body
LE: loop exit
PB: predicated region body
PF: predicated region fallthrough
CT: control target
= control target key end

     0   :  { %8 = vsyncpa [#allocation4], 0  ;;  %s874_s0 = inlined_call_operand.hbm [shape: f32[8,128], index: 0, kind: input, shape index: {}]   ;;  %s875_s1 = inlined_call_operand.hbm [shape: f32[16,128], index: 1, kind: input, shape index: {}]   ;;  %s876_s2 = inlined_call_operand.hbm [shape: f32[16,128], index: 2, kind: input, shape index: {}]   ;;  %s877_s3 = inlined_call_operand.hbm [shape: f32[16,128], index: 3, kind: output, shape index: {}]  }
   0x1   :  { %9 = vsyncpa [#allocation7], 0 }
   0x2   :  { %11 = vsyncpa [#allocation7 + $0x1], 0 }
   0x3   :  { %12 = vsyncpa [#allocation5], 0 }
   0x4   :  { %14 = vsyncpa [#allocation5 + $0x1], 0  ;;  %s710_s12 = smov 0   ;;  %s712_s13 = smov 0  }
   0x5   :  { %s714_s14 = smov 0   ;;  %s716_s15 = smov 0  }
   0x6   :  { %s718_s16 = smov 0   ;;  %s720_s17 = smov 0  }
   0x7 LB: > { %s32_s18 = sadd.s32 1, %s683_s16  ;;  %s62_s19 = sadd.s32 1, %s675_s14  ;;  %s687_s17 = sphi %s720_s17, %s20_s17   ;;  %s683_s16 = sphi %s718_s16, %s888_s16   ;;  %s679_s15 = sphi %s716_s15, %s887_s15   ;;  %s675_s14 = sphi %s714_s14, %s886_s14   ;;  %s671_s13 = sphi %s712_s13, %s885_s13   ;;  %s667_s12 = sphi %s710_s12, %s884_s12  }
   0x8   : > { %p34_p0 = scmp.ge.s32.totalorder %s32_s18, 2  ;;  %p69_p1 = scmp.ne.s32.totalorder %s675_s14, %s671_s13 }
   0x9   : > { %p70_p2 = scmp.eq.s32.totalorder %s687_s17, 0  ;;  %p419_p3 = scmp.ge.s32.totalorder %s687_s17, 2 }
   0xa   : > { %s890_s18 = smov (%p34_p0, %s32_s18), 0  ;;  %p459_p5 = scmp.lt.s32.totalorder %s687_s17, 2 }
   0xb   : > { %p751_p4 = por %p70_p2, %p69_p1  ;;  %s59_s21 = ssub.s32 %s683_s16, %s890_s18 }
   0xc   : > { %s165_s22 = sand.u32 1, %s687_s17   ;;  %p60_p6 = scmp.eq.s32.totalorder %s59_s21, 0 }
   0xd   : > { %s167_s23 = sand.u32 1, %s675_s14   ;;  %s421_s24 = sshll.u32 %s683_s16, 3 }
   0xe   : > { %s762_s25 = scalar_select %p60_p6, %s675_s14, %s62_s19  }
   0xf   : > { %s764_s26 = sshll.u32 %s167_s23, 3  ;;  %s174_s29 = scalar_lea.hbm %s875_s1, %s421_s24 }
  0x10   : > { %s176_s30 = sshll.u32 %s174_s29, 4  ;;  %s169_s4 = scalar_lea.vmem [#allocation6], %s764_s26  ;;  %s177_s30 = int_to_ptr.hbm [resolvable:$true] %s176_s30 }
  0x11   : > { %s178_s5 = sshll.u32 %s169_s4, 4  ;;  %p774_p7 = pnand %p459_p5, %p751_p4  ;;  %s179_s5 = int_to_ptr.vmem [resolvable:$true] %s178_s5 }
  0x12   : > { %s194_s9 = scalar_lea.hbm %s876_s2, %s421_s24  ;;  %s166_s10 = scalar_lea.sflag [#allocation7], %s165_s22 }
  0x13   : > { %450 = dma.hbm_to_vmem [thread:$0]  (!%p774_p7), %s177_s30, 128, %s179_s5, %s166_s10  }
  0x14   : > { %s784_s11 = sadd.s32 4294967295, %s687_s17   ;;  %s416_s19 = sadd.s32 4294967294, %s687_s17  }
  0x15   : > { %p75_p8 = scmp.ne.s32.totalorder %s671_s13, %s667_s12  ;;  %p76_p9 = scmp.eq.s32.totalorder %s784_s11, 0 }
  0x16   : > { %p127_p10 = scmp.eq.s32.totalorder %s784_s11, 1  ;;  %p133_p11 = scmp.eq.s32.totalorder %s416_s19, 1 }
  0x17   : > { %p417_p12 = scmp.ge.s32.totalorder %s687_s17, 1  ;;  %p794_p13 = por %p76_p9, %p75_p8 }
  0x18   : > { %p801_p0 = por %p127_p10, %p69_p1  ;;  %p805_p2 = por %p133_p11, %p75_p8 }
  0x19   : > { %p140_p4 = scmp.lt.s32.totalorder %s687_s17, 3  ;;  %s152_s28 = sshll.u32 %s874_s0, 4  ;;  %s153_s28 = int_to_ptr.hbm [resolvable:$true] %s152_s28 }
  0x1a   : > { %s196_s29 = sshll.u32 %s194_s9, 4  ;;  %s689_s30 = smov [#allocation3]   ;;  %s197_s29 = int_to_ptr.hbm [resolvable:$true] %s196_s29 }
  0x1b   : > { %p810_p5 = pnand %p417_p12, %p140_p4  ;;  %s154_s4 = sshll.u32 %s689_s30, 4  ;;  %s155_s4 = int_to_ptr.vmem [resolvable:$true] %s154_s4 }
  0x1c   : > { %s189_s5 = scalar_lea.vmem [#allocation8], %s764_s26 }
  0x1d   : > { %p443_p1 = pneg %p810_p5  ;;  %s198_s7 = sshll.u32 %s189_s5, 4  ;;  %s199_s7 = int_to_ptr.vmem [resolvable:$true] %s198_s7 }
  0x1e   : > { %453 = dma.hbm_to_vmem [thread:$0]  (!%p774_p7), %s197_s29, 128, %s199_s7, %s166_s10  }
  0x1f   : > { %p444_p6 = pnand %p443_p1, %p76_p9  ;;  %207 = sbr.rel (%p810_p5) target bundleno = 58 (0x3a), region = 32 }
  0x21   : > { %446 = dma.hbm_to_vmem [thread:$0]  (!%p444_p6), %s153_s28, 128, %s155_s4, [#allocation4]  }
  0x24   : > { %654 = dma.done.wait (%p76_p9), [#allocation4], 128  }
  0x25   : > { %656 = vsyncadd (%p76_p9), [#allocation4], 4294967168  ;;  %s214_s8 = sand.u32 1, %s784_s11   ;;  %s216_s26 = sand.u32 1, %s671_s13  }
  0x26   : > { %s426_s9 = sshll.u32 %s216_s26, 3  ;;  %s215_s19 = scalar_lea.sflag [#allocation7], %s214_s8 }
  0x27   : > { %s218_s24 = scalar_lea.vmem [#allocation6], %s426_s9 }
  0x28   : > { %658 = dma.done.wait (%p794_p13), %s215_s19, 256  }
  0x29   : > { %660 = vsyncadd (%p794_p13), %s215_s19, 4294967040  ;;  %p281_p7 = scmp.eq.s32.totalorder %s679_s15, 0  ;;  %s430_s10 = sshll.u32 %s679_s15, 3  ;;  %v264_v0 = vld [vmem:[%s218_s24] sm:$0xff]  ;;  %v277_v2 = vld [vmem:[#allocation3] sm:$0xff] }
  0x2a   : > { %s228_s23 = scalar_lea.vmem [#allocation8], %s426_s9  ;;  %v278_v4 = vsub.f32 1.0, %v277_v2  ;;  %s298_s28 = scalar_lea.hbm %s877_s3, %s430_s10 }
  0x2b   : > { %s282_s6 = scalar_select %p281_p7, 0.025, 0.0  ;;  %v265_v1 = vld [vmem:[%s228_s23] sm:$0xff] }
  0x2c   : > { %v266_v3 = vsub.f32 %v264_v0, %v265_v1  ;;  %v279_v7 = vmul.f32 %v278_v4, %v278_v4  ;;  %s256_s20 = scalar_lea.vmem [#allocation9], %s426_s9  ;;  %s302_s30 = sshll.u32 %s298_s28, 4  ;;  %s303_s30 = int_to_ptr.hbm [resolvable:$true] %s302_s30 }
  0x2d   : > { %v283_v5 = vstv %s282_s6  ;;  %s300_s29 = sshll.u32 %s256_s20, 4  ;;  %s288_s15 = scalar_lea.sflag [#allocation5], %s216_s26  ;;  %s301_s29 = int_to_ptr.vmem [resolvable:$true] %s300_s29 }
  0x2e   : > { %v267_v6 = vand.u32 2147483647, %v266_v3  ;;  %v284_v9 = vmul.f32 %v283_v5, %v279_v7  ;;  %s615_s4 = sshra.s32 %s303_s30, 4  ;;  %s621_s9 = scalar_lea.hbm %s877_s3, 16  ;;  %s616_s4 = int_to_ptr.hbm [resolvable:$true] %s615_s4 }
  0x2f   : > { %s617_s5 = scalar_lea.hbm %s616_s4, 8  ;;  %p622_p11 = scmp.lt.s32.totalorder %s616_s4, %s877_s3 }
  0x30   : > { %v276_v8 = vmul.f32 0.00048828125, %v267_v6  ;;  %p618_p8 = scmp.ne.s32.totalorder %s616_s4, %s617_s5  ;;  %p623_p12 = scmp.lt.s32.totalorder %s621_s9, %s617_s5 }
  0x32   : > { %v285_v10 = vadd.f32 %v284_v9, %v276_v8  ;;  %p619_p9 = pnand %p618_p8, %p801_p0  ;;  %p624_p13 = por %p623_p12, %p622_p11 }
  0x34   : > { %286 = vst [vmem:[%s256_s20] sm:$0xff] %v285_v10  ;;  %p620_p10 = pneg %p619_p9 }
  0x36   : > { %p625_p4 = pnand %p624_p13, %p620_p10 }
  0x38   : > { %628 = shalt.err (!%p625_p4)
}
  0x39   : > { %441 = dma.vmem_to_hbm [thread:$0]  (%p801_p0), %s301_s29, 128, %s303_s30, %s288_s15  }
  0x3a PF: > { %s314_s26 = sand.u32 1, %s667_s12   ;;  %p455_p5 = pnand %p419_p3, %p805_p2 }
  0x3b   : > { %s315_s6 = scalar_lea.sflag [#allocation5], %s314_s26 }
  0x3c   : > { %p456_p1 = pneg %p455_p5 }
  0x3e   : > { %662 = dma.done.wait (%p456_p1), %s315_s6, 128  }
  0x3f   : > { %664 = vsyncadd (%p456_p1), %s315_s6, 4294967168  ;;  %s20_s17 = sadd.s32 1, %s687_s17   ;;  %s884_s12 = smov %s671_s13 }
  0x40   : > { %p17_p6 = scmp.ge.s32.totalorder %s20_s17, 4   ;;  %s885_s13 = smov %s675_s14 }
  0x41   : > { %s886_s14 = smov %s762_s25  ;;  %s887_s15 = smov %s683_s16 }
  0x42   : > { %s888_s16 = smov %s890_s18  ;;  %19 = sbr.rel (!%p17_p6) target bundleno = 7 (0x7), region = 101 }
  0x47   :  { %321 = vsyncpa [#allocation4], 1 }
  0x48   :  { %323 = vsyncpa [#allocation4 + $0x1], 1 }
  0x49   :  { %324 = vsyncpa [#allocation7], 1 }
  0x4a   :  { %326 = vsyncpa [#allocation7 + $0x1], 1 }
  0x4b   :  { %327 = vsyncpa [#allocation5], 1 }
  0x4c   :  { %329 = vsyncpa [#allocation5 + $0x1], 1 }

</bundles_post_ra>
